<compile_context>
chip_gen: v7x
topology: tpu7x:2x2x1
jax: 0.10.0
libtpu: 0.0.40
codegen_flags: <defaults>
</compile_context>

<pallas_src>
import functools

import numpy as np
import jax
import jax.numpy as jnp
from jax.experimental import pallas as pl
from jax.experimental.pallas import tpu as pltpu


# ----------------------------------------------------------------------------
# Bilinear (align_corners=False) 1-D interpolation coefficients, PyTorch rules.
# ----------------------------------------------------------------------------
def _interp_1d_coeffs(d_out, d_in):
    o = np.arange(d_out, dtype=np.float64)
    src = (o + 0.5) * (d_in / d_out) - 0.5
    src = np.maximum(src, 0.0)                       # torch clamps negative src to 0
    lo = np.minimum(np.floor(src).astype(np.int64), d_in - 1)
    hi = np.minimum(lo + 1, d_in - 1)
    frac = (src - lo).astype(np.float32)
    return lo, hi, frac


def _interp_matrix_1d(d_out, d_in):
    """Dense (d_out, d_in) 1-D bilinear matrix (reference / W-direction operand)."""
    lo, hi, frac = _interp_1d_coeffs(d_out, d_in)
    m = np.zeros((d_out, d_in), dtype=np.float32)
    idx = np.arange(d_out)
    m[idx, lo] += 1.0 - frac
    m[idx, hi] += frac
    return m


# ----------------------------------------------------------------------------
# Pallas kernel: one image per grid step.
# ----------------------------------------------------------------------------
def _r2_kernel(p_ref, w_ref, shift_ref, x_ref, wwT_ref, o_ref, *,
               C, Ho, Wo, h_lo, h_hi, h_frac):
    # p_ref:     (1, Cin*9, Ho*Wo)  transposed im2col patches (bf16)
    # w_ref:     (Cout, Cin*9)      conv weight with BN scale folded in (bf16)
    # shift_ref: (Cout, 1)          fused conv-bias / BN shift (f32)
    # x_ref:     (1, H*Cin, W)      input, rows ordered (h, c), for the interp matmul
    # wwT_ref:   (W, Wo)            1-D bilinear matrix for the W direction (bf16)
    # o_ref:     (1, Cout, Ho*Wo)   output, spatial flattened in lanes (NCHW-ready)

    # --- strided 3x3 conv as one lane-dense matmul (+ fused BN shift + ReLU) -----
    conv = jnp.dot(w_ref[...], p_ref[0],
                   preferred_element_type=jnp.float32)            # (Cout, Ho*Wo) f32
    x_u = jnp.maximum(conv + shift_ref[...], 0.0)

    # --- separable bilinear downsample -------------------------------------------
    # W direction: single matmul; x is pre-laid-out (H*C, W) so no in-kernel reshape.
    xw = jnp.dot(x_ref[0], wwT_ref[...],
                 preferred_element_type=jnp.float32)              # (H*C, Wo) f32

    # H direction: each bilinear output row mixes exactly two source rows
    # (coefficients are trace-time Python constants -> static unroll, static slices).
    for oh in range(Ho):
        lo, hi, f = h_lo[oh], h_hi[oh], h_frac[oh]
        row_lo = xw[lo * C:(lo + 1) * C, :]                       # (C, Wo)
        row_hi = xw[hi * C:(hi + 1) * C, :]
        x_d = row_lo * (1.0 - f) + row_hi * f
        o_ref[0, :, oh * Wo:(oh + 1) * Wo] = (
            x_u[:, oh * Wo:(oh + 1) * Wo] + x_d).astype(o_ref.dtype)


# ----------------------------------------------------------------------------
# Host-side glue.
# ----------------------------------------------------------------------------
def _im2col_T_stride2_pad1(x, Ho, Wo):
    """(N,Cin,H,W) -> (N, Cin*9, Ho*Wo) transposed im2col for a 3x3/s2/p1 conv."""
    N, Cin, H, W = x.shape
    xp = jnp.pad(x, ((0, 0), (0, 0), (1, 1), (1, 1)))
    taps = [xp[:, :, kh:kh + 2 * Ho:2, kw:kw + 2 * Wo:2]          # each (N,Cin,Ho,Wo)
            for kh in range(3) for kw in range(3)]
    p = jnp.stack(taps, axis=2)                                   # (N, Cin, 9, Ho, Wo)
    return p.reshape(N, Cin * 9, Ho * Wo)


def r2_forward(x, conv_w, conv_b, bn_gamma, bn_beta, bn_mean, bn_var,
               eps=1e-5, use_bf16=True):
    """x: (N, Cin, H, W) f32 NCHW.  Returns (N, Cout, Ho, Wo)."""
    N, Cin, H, W = x.shape
    Cout = conv_w.shape[0]
    assert Cin == Cout, "R2 residual add requires in_channels == out_channels"
    Ho = (H + 2 - 3) // 2 + 1
    Wo = (W + 2 - 3) // 2 + 1
    S = Ho * Wo
    cdtype = jnp.bfloat16 if use_bf16 else x.dtype

    # Fuse inference-mode BatchNorm into the conv weight and a per-channel shift.
    # TODO(synk): training-mode BatchNorm (batch statistics) is not modeled.
    scale = bn_gamma / jnp.sqrt(bn_var + eps)                               # (Cout,)
    w_mat = (conv_w * scale[:, None, None, None]).reshape(Cout, Cin * 9)
    shift = ((conv_b - bn_mean) * scale + bn_beta).reshape(Cout, 1).astype(jnp.float32)

    # Conv operand: transposed im2col (K-major, spatial in lanes).
    # TODO(synk): patches are ~2.25x the input bytes (9 taps on the stride-2 grid);
    # an in-kernel 9-tap accumulation over a space-to-depth layout would remove that
    # extra DMA traffic at the cost of extra kernel complexity.
    patches = _im2col_T_stride2_pad1(x, Ho, Wo).astype(cdtype)              # (N,Cin*9,S)

    # Separable bilinear operands.
    wwT = jnp.asarray(_interp_matrix_1d(Wo, W).T, dtype=cdtype)             # (W, Wo)
    h_lo, h_hi, h_frac = _interp_1d_coeffs(Ho, H)
    h_lo = tuple(int(v) for v in h_lo)
    h_hi = tuple(int(v) for v in h_hi)
    h_frac = tuple(float(v) for v in h_frac)

    # Input for the interp matmul, rows ordered (h, c) so the kernel never reshapes.
    x_interp = jnp.transpose(x, (0, 2, 1, 3)).reshape(N, H * Cin, W).astype(cdtype)

    kernel = functools.partial(_r2_kernel, C=Cin, Ho=Ho, Wo=Wo,
                               h_lo=h_lo, h_hi=h_hi, h_frac=h_frac)

    # Batch-only grid (marked parallel for v7x megacore); every block's trailing dims
    # equal the full array dims, so no (8,128) divisibility issues at small sizes.
    # TODO(synk): for large HRNet resolutions add a second grid axis tiling Ho*Wo
    # (256-512 lanes per tile) so per-step VMEM stays small and DMA is pipelined.
    out = pl.pallas_call(
        kernel,
        out_shape=jax.ShapeDtypeStruct((N, Cout, S), x.dtype),
        grid=(N,),
        in_specs=[
            pl.BlockSpec((1, Cin * 9, S), lambda n: (n, 0, 0)),   # patches
            pl.BlockSpec((Cout, Cin * 9), lambda n: (0, 0)),      # fused conv weight
            pl.BlockSpec((Cout, 1), lambda n: (0, 0)),            # fused BN shift
            pl.BlockSpec((1, H * Cin, W), lambda n: (n, 0, 0)),   # x for interp
            pl.BlockSpec((W, Wo), lambda n: (0, 0)),              # W-interp matrix
        ],
        out_specs=pl.BlockSpec((1, Cout, S), lambda n: (n, 0, 0)),
        compiler_params=pltpu.CompilerParams(
            dimension_semantics=("parallel",),          # megacore sharding on v7x
            vmem_limit_bytes=32 * 1024 * 1024,
        ),
    )(patches, w_mat.astype(cdtype), shift, x_interp, wwT)

    # (N, Cout, Ho*Wo) is already channel-major: a free reshape gives NCHW.
    return out.reshape(N, Cout, Ho, Wo)


# ----------------------------------------------------------------------------
# Reference (plain JAX / XLA) for validation.
# ----------------------------------------------------------------------------
def r2_reference(x, conv_w, conv_b, bn_gamma, bn_beta, bn_mean, bn_var, eps=1e-5):
    N, Cin, H, W = x.shape
    Cout = conv_w.shape[0]
    conv = jax.lax.conv_general_dilated(
        x, conv_w, window_strides=(2, 2), padding=((1, 1), (1, 1)),
        dimension_numbers=('NCHW', 'OIHW', 'NCHW'))
    conv = conv + conv_b.reshape(1, Cout, 1, 1)
    inv = (bn_gamma / jnp.sqrt(bn_var + eps)).reshape(1, Cout, 1, 1)
    x_u = jnp.maximum((conv - bn_mean.reshape(1, Cout, 1, 1)) * inv
                      + bn_beta.reshape(1, Cout, 1, 1), 0.0)
    Ho, Wo = x_u.shape[2], x_u.shape[3]
    Wh = jnp.asarray(_interp_matrix_1d(Ho, H))
    Ww = jnp.asarray(_interp_matrix_1d(Wo, W))
    x_d = jnp.einsum('ah,bw,nchw->ncab', Wh, Ww, x)
    return x_u + x_d


# ----------------------------------------------------------------------------
if __name__ == "__main__":
    # in_channels must equal out_channels for the residual add (as in the module).
    N, C, H, W = 2, 8, 16, 16

    key = jax.random.PRNGKey(0)
    kx, kw, kb, kg, kbe, km, kv = jax.random.split(key, 7)
    x = jax.random.normal(kx, (N, C, H, W), jnp.float32)

    conv_w = 0.1 * jax.random.normal(kw, (C, C, 3, 3), jnp.float32)
    conv_b = 0.1 * jax.random.normal(kb, (C,), jnp.float32)
    bn_gamma = 1.0 + 0.1 * jax.random.normal(kg, (C,), jnp.float32)
    bn_beta = 0.1 * jax.random.normal(kbe, (C,), jnp.float32)
    bn_mean = 0.1 * jax.random.normal(km, (C,), jnp.float32)
    bn_var = 1.0 + 0.1 * jnp.abs(jax.random.normal(kv, (C,), jnp.float32))

    out = r2_forward(x, conv_w, conv_b, bn_gamma, bn_beta, bn_mean, bn_var)
    out = jax.block_until_ready(out)

    ref = r2_reference(x, conv_w, conv_b, bn_gamma, bn_beta, bn_mean, bn_var)
    # Loose tolerance because matmul operands are cast to bf16 (f32 accumulation).
    np.testing.assert_allclose(np.asarray(out), np.asarray(ref), atol=3e-2, rtol=3e-2)

    print("KERNEL_OK")
</pallas_src>

<mosaic_0001>
module attributes {stable_mosaic.version = 11 : i64} {
  func.func @_r2_kernel(%arg0: i32, %arg1: memref<1x72x64xbf16, #tpu.memory_space<vmem>>, %arg2: memref<8x72xbf16, #tpu.memory_space<vmem>>, %arg3: memref<8x1xf32, #tpu.memory_space<vmem>>, %arg4: memref<1x128x16xbf16, #tpu.memory_space<vmem>>, %arg5: memref<16x8xbf16, #tpu.memory_space<vmem>>, %arg6: memref<1x8x64xf32, #tpu.memory_space<vmem>>) attributes {dimension_semantics = [#tpu.dimension_semantics<parallel>], iteration_bounds = array<i64: 2>, scalar_prefetch = 0 : i64, scratch_operands = 0 : i64, tpu.core_type = #tpu.core_type<tc>, window_params = [{transform_indices = @transform_0, window_bounds = array<i64: 1, 72, 64>}, {pipeline_mode = #tpu.pipeline_mode<synchronous>, transform_indices = @transform_1, window_bounds = array<i64: 8, 72>}, {pipeline_mode = #tpu.pipeline_mode<synchronous>, transform_indices = @transform_2, window_bounds = array<i64: 8, 1>}, {transform_indices = @transform_3, window_bounds = array<i64: 1, 128, 16>}, {pipeline_mode = #tpu.pipeline_mode<synchronous>, transform_indices = @transform_4, window_bounds = array<i64: 16, 8>}, {transform_indices = @transform_5, window_bounds = array<i64: 1, 8, 64>}]} {
    %c0 = arith.constant 0 : index
    %c0_0 = arith.constant 0 : index
    %0 = vector.load %arg2[%c0, %c0_0] : memref<8x72xbf16, #tpu.memory_space<vmem>>, vector<8x72xbf16>
    %c0_1 = arith.constant 0 : index
    %c0_2 = arith.constant 0 : index
    %c0_3 = arith.constant 0 : index
    %1 = vector.load %arg1[%c0_1, %c0_2, %c0_3] : memref<1x72x64xbf16, #tpu.memory_space<vmem>>, vector<1x72x64xbf16>
    %2 = vector.shape_cast %1 : vector<1x72x64xbf16> to vector<72x64xbf16>
    %cst = arith.constant dense<0.000000e+00> : vector<8x64xf32>
    %3 = tpu.matmul %0, %2, %cst {dimension_numbers = #tpu.dot_dimension_numbers<[1], [0], [0], [1], [0, 0, 1, 1], [], []>} : vector<8x72xbf16>, vector<72x64xbf16>, vector<8x64xf32> -> vector<8x64xf32>
    %c0_4 = arith.constant 0 : index
    %c0_5 = arith.constant 0 : index
    %4 = vector.load %arg3[%c0_4, %c0_5] : memref<8x1xf32, #tpu.memory_space<vmem>>, vector<8x1xf32>
    %5 = vector.broadcast %4 : vector<8x1xf32> to vector<8x64xf32>
    %6 = arith.addf %3, %5 : vector<8x64xf32>
    %cst_6 = arith.constant 0.000000e+00 : f32
    %7 = vector.broadcast %cst_6 : f32 to vector<8x64xf32>
    %8 = arith.maximumf %6, %7 : vector<8x64xf32>
    %c0_7 = arith.constant 0 : index
    %c0_8 = arith.constant 0 : index
    %c0_9 = arith.constant 0 : index
    %9 = vector.load %arg4[%c0_7, %c0_8, %c0_9] : memref<1x128x16xbf16, #tpu.memory_space<vmem>>, vector<1x128x16xbf16>
    %10 = vector.shape_cast %9 : vector<1x128x16xbf16> to vector<128x16xbf16>
    %c0_10 = arith.constant 0 : index
    %c0_11 = arith.constant 0 : index
    %11 = vector.load %arg5[%c0_10, %c0_11] : memref<16x8xbf16, #tpu.memory_space<vmem>>, vector<16x8xbf16>
    %cst_12 = arith.constant dense<0.000000e+00> : vector<128x8xf32>
    %12 = tpu.matmul %10, %11, %cst_12 {dimension_numbers = #tpu.dot_dimension_numbers<[1], [0], [0], [1], [0, 0, 1, 1], [], []>} : vector<128x16xbf16>, vector<16x8xbf16>, vector<128x8xf32> -> vector<128x8xf32>
    %13 = vector.extract_strided_slice %12 {offsets = [0, 0], sizes = [8, 8], strides = [1, 1]} : vector<128x8xf32> to vector<8x8xf32>
    %14 = vector.extract_strided_slice %12 {offsets = [8, 0], sizes = [8, 8], strides = [1, 1]} : vector<128x8xf32> to vector<8x8xf32>
    %cst_13 = arith.constant 5.000000e-01 : f32
    %15 = vector.broadcast %cst_13 : f32 to vector<8x8xf32>
    %16 = arith.mulf %13, %15 : vector<8x8xf32>
    %cst_14 = arith.constant 5.000000e-01 : f32
    %17 = vector.broadcast %cst_14 : f32 to vector<8x8xf32>
    %18 = arith.mulf %14, %17 : vector<8x8xf32>
    %19 = arith.addf %16, %18 : vector<8x8xf32>
    %20 = vector.extract_strided_slice %8 {offsets = [0, 0], sizes = [8, 8], strides = [1, 1]} : vector<8x64xf32> to vector<8x8xf32>
    %21 = arith.addf %20, %19 : vector<8x8xf32>
    %c0_15 = arith.constant 0 : index
    %c0_16 = arith.constant 0 : index
    %c0_17 = arith.constant 0 : index
    %22 = vector.load %arg6[%c0_15, %c0_16, %c0_17] : memref<1x8x64xf32, #tpu.memory_space<vmem>>, vector<1x8x8xf32>
    %23 = vector.shape_cast %22 : vector<1x8x8xf32> to vector<8x8xf32>
    %24 = vector.shape_cast %21 : vector<8x8xf32> to vector<1x8x8xf32>
    tpu.vector_store %arg6[%c0_15, %c0_16, %c0_17], %24 {strides = array<i32>} : memref<1x8x64xf32, #tpu.memory_space<vmem>>, vector<1x8x8xf32>,
    %25 = vector.extract_strided_slice %12 {offsets = [16, 0], sizes = [8, 8], strides = [1, 1]} : vector<128x8xf32> to vector<8x8xf32>
    %26 = vector.extract_strided_slice %12 {offsets = [24, 0], sizes = [8, 8], strides = [1, 1]} : vector<128x8xf32> to vector<8x8xf32>
    %cst_18 = arith.constant 5.000000e-01 : f32
    %27 = vector.broadcast %cst_18 : f32 to vector<8x8xf32>
    %28 = arith.mulf %25, %27 : vector<8x8xf32>
    %cst_19 = arith.constant 5.000000e-01 : f32
    %29 = vector.broadcast %cst_19 : f32 to vector<8x8xf32>
    %30 = arith.mulf %26, %29 : vector<8x8xf32>
    %31 = arith.addf %28, %30 : vector<8x8xf32>
    %32 = vector.extract_strided_slice %8 {offsets = [0, 8], sizes = [8, 8], strides = [1, 1]} : vector<8x64xf32> to vector<8x8xf32>
    %33 = arith.addf %32, %31 : vector<8x8xf32>
    %c0_20 = arith.constant 0 : index
    %c0_21 = arith.constant 0 : index
    %c8 = arith.constant 8 : index
    %34 = vector.load %arg6[%c0_20, %c0_21, %c8] : memref<1x8x64xf32, #tpu.memory_space<vmem>>, vector<1x8x8xf32>
    %35 = vector.shape_cast %34 : vector<1x8x8xf32> to vector<8x8xf32>
    %36 = vector.shape_cast %33 : vector<8x8xf32> to vector<1x8x8xf32>
    tpu.vector_store %arg6[%c0_20, %c0_21, %c8], %36 {strides = array<i32>} : memref<1x8x64xf32, #tpu.memory_space<vmem>>, vector<1x8x8xf32>,
    %37 = vector.extract_strided_slice %12 {offsets = [32, 0], sizes = [8, 8], strides = [1, 1]} : vector<128x8xf32> to vector<8x8xf32>
    %38 = vector.extract_strided_slice %12 {offsets = [40, 0], sizes = [8, 8], strides = [1, 1]} : vector<128x8xf32> to vector<8x8xf32>
    %cst_22 = arith.constant 5.000000e-01 : f32
    %39 = vector.broadcast %cst_22 : f32 to vector<8x8xf32>
    %40 = arith.mulf %37, %39 : vector<8x8xf32>
    %cst_23 = arith.constant 5.000000e-01 : f32
    %41 = vector.broadcast %cst_23 : f32 to vector<8x8xf32>
    %42 = arith.mulf %38, %41 : vector<8x8xf32>
    %43 = arith.addf %40, %42 : vector<8x8xf32>
    %44 = vector.extract_strided_slice %8 {offsets = [0, 16], sizes = [8, 8], strides = [1, 1]} : vector<8x64xf32> to vector<8x8xf32>
    %45 = arith.addf %44, %43 : vector<8x8xf32>
    %c0_24 = arith.constant 0 : index
    %c0_25 = arith.constant 0 : index
    %c16 = arith.constant 16 : index
    %46 = vector.load %arg6[%c0_24, %c0_25, %c16] : memref<1x8x64xf32, #tpu.memory_space<vmem>>, vector<1x8x8xf32>
    %47 = vector.shape_cast %46 : vector<1x8x8xf32> to vector<8x8xf32>
    %48 = vector.shape_cast %45 : vector<8x8xf32> to vector<1x8x8xf32>
    tpu.vector_store %arg6[%c0_24, %c0_25, %c16], %48 {strides = array<i32>} : memref<1x8x64xf32, #tpu.memory_space<vmem>>, vector<1x8x8xf32>,
    %49 = vector.extract_strided_slice %12 {offsets = [48, 0], sizes = [8, 8], strides = [1, 1]} : vector<128x8xf32> to vector<8x8xf32>
    %50 = vector.extract_strided_slice %12 {offsets = [56, 0], sizes = [8, 8], strides = [1, 1]} : vector<128x8xf32> to vector<8x8xf32>
    %cst_26 = arith.constant 5.000000e-01 : f32
    %51 = vector.broadcast %cst_26 : f32 to vector<8x8xf32>
    %52 = arith.mulf %49, %51 : vector<8x8xf32>
    %cst_27 = arith.constant 5.000000e-01 : f32
    %53 = vector.broadcast %cst_27 : f32 to vector<8x8xf32>
    %54 = arith.mulf %50, %53 : vector<8x8xf32>
    %55 = arith.addf %52, %54 : vector<8x8xf32>
    %56 = vector.extract_strided_slice %8 {offsets = [0, 24], sizes = [8, 8], strides = [1, 1]} : vector<8x64xf32> to vector<8x8xf32>
    %57 = arith.addf %56, %55 : vector<8x8xf32>
    %c0_28 = arith.constant 0 : index
    %c0_29 = arith.constant 0 : index
    %c24 = arith.constant 24 : index
    %58 = vector.load %arg6[%c0_28, %c0_29, %c24] : memref<1x8x64xf32, #tpu.memory_space<vmem>>, vector<1x8x8xf32>
    %59 = vector.shape_cast %58 : vector<1x8x8xf32> to vector<8x8xf32>
    %60 = vector.shape_cast %57 : vector<8x8xf32> to vector<1x8x8xf32>
    tpu.vector_store %arg6[%c0_28, %c0_29, %c24], %60 {strides = array<i32>} : memref<1x8x64xf32, #tpu.memory_space<vmem>>, vector<1x8x8xf32>,
    %61 = vector.extract_strided_slice %12 {offsets = [64, 0], sizes = [8, 8], strides = [1, 1]} : vector<128x8xf32> to vector<8x8xf32>
    %62 = vector.extract_strided_slice %12 {offsets = [72, 0], sizes = [8, 8], strides = [1, 1]} : vector<128x8xf32> to vector<8x8xf32>
    %cst_30 = arith.constant 5.000000e-01 : f32
    %63 = vector.broadcast %cst_30 : f32 to vector<8x8xf32>
    %64 = arith.mulf %61, %63 : vector<8x8xf32>
    %cst_31 = arith.constant 5.000000e-01 : f32
    %65 = vector.broadcast %cst_31 : f32 to vector<8x8xf32>
    %66 = arith.mulf %62, %65 : vector<8x8xf32>
    %67 = arith.addf %64, %66 : vector<8x8xf32>
    %68 = vector.extract_strided_slice %8 {offsets = [0, 32], sizes = [8, 8], strides = [1, 1]} : vector<8x64xf32> to vector<8x8xf32>
    %69 = arith.addf %68, %67 : vector<8x8xf32>
    %c0_32 = arith.constant 0 : index
    %c0_33 = arith.constant 0 : index
    %c32 = arith.constant 32 : index
    %70 = vector.load %arg6[%c0_32, %c0_33, %c32] : memref<1x8x64xf32, #tpu.memory_space<vmem>>, vector<1x8x8xf32>
    %71 = vector.shape_cast %70 : vector<1x8x8xf32> to vector<8x8xf32>
    %72 = vector.shape_cast %69 : vector<8x8xf32> to vector<1x8x8xf32>
    tpu.vector_store %arg6[%c0_32, %c0_33, %c32], %72 {strides = array<i32>} : memref<1x8x64xf32, #tpu.memory_space<vmem>>, vector<1x8x8xf32>,
    %73 = vector.extract_strided_slice %12 {offsets = [80, 0], sizes = [8, 8], strides = [1, 1]} : vector<128x8xf32> to vector<8x8xf32>
    %74 = vector.extract_strided_slice %12 {offsets = [88, 0], sizes = [8, 8], strides = [1, 1]} : vector<128x8xf32> to vector<8x8xf32>
    %cst_34 = arith.constant 5.000000e-01 : f32
    %75 = vector.broadcast %cst_34 : f32 to vector<8x8xf32>
    %76 = arith.mulf %73, %75 : vector<8x8xf32>
    %cst_35 = arith.constant 5.000000e-01 : f32
    %77 = vector.broadcast %cst_35 : f32 to vector<8x8xf32>
    %78 = arith.mulf %74, %77 : vector<8x8xf32>
    %79 = arith.addf %76, %78 : vector<8x8xf32>
    %80 = vector.extract_strided_slice %8 {offsets = [0, 40], sizes = [8, 8], strides = [1, 1]} : vector<8x64xf32> to vector<8x8xf32>
    %81 = arith.addf %80, %79 : vector<8x8xf32>
    %c0_36 = arith.constant 0 : index
    %c0_37 = arith.constant 0 : index
    %c40 = arith.constant 40 : index
    %82 = vector.load %arg6[%c0_36, %c0_37, %c40] : memref<1x8x64xf32, #tpu.memory_space<vmem>>, vector<1x8x8xf32>
    %83 = vector.shape_cast %82 : vector<1x8x8xf32> to vector<8x8xf32>
    %84 = vector.shape_cast %81 : vector<8x8xf32> to vector<1x8x8xf32>
    tpu.vector_store %arg6[%c0_36, %c0_37, %c40], %84 {strides = array<i32>} : memref<1x8x64xf32, #tpu.memory_space<vmem>>, vector<1x8x8xf32>,
    %85 = vector.extract_strided_slice %12 {offsets = [96, 0], sizes = [8, 8], strides = [1, 1]} : vector<128x8xf32> to vector<8x8xf32>
    %86 = vector.extract_strided_slice %12 {offsets = [104, 0], sizes = [8, 8], strides = [1, 1]} : vector<128x8xf32> to vector<8x8xf32>
    %cst_38 = arith.constant 5.000000e-01 : f32
    %87 = vector.broadcast %cst_38 : f32 to vector<8x8xf32>
    %88 = arith.mulf %85, %87 : vector<8x8xf32>
    %cst_39 = arith.constant 5.000000e-01 : f32
    %89 = vector.broadcast %cst_39 : f32 to vector<8x8xf32>
    %90 = arith.mulf %86, %89 : vector<8x8xf32>
    %91 = arith.addf %88, %90 : vector<8x8xf32>
    %92 = vector.extract_strided_slice %8 {offsets = [0, 48], sizes = [8, 8], strides = [1, 1]} : vector<8x64xf32> to vector<8x8xf32>
    %93 = arith.addf %92, %91 : vector<8x8xf32>
    %c0_40 = arith.constant 0 : index
    %c0_41 = arith.constant 0 : index
    %c48 = arith.constant 48 : index
    %94 = vector.load %arg6[%c0_40, %c0_41, %c48] : memref<1x8x64xf32, #tpu.memory_space<vmem>>, vector<1x8x8xf32>
    %95 = vector.shape_cast %94 : vector<1x8x8xf32> to vector<8x8xf32>
    %96 = vector.shape_cast %93 : vector<8x8xf32> to vector<1x8x8xf32>
    tpu.vector_store %arg6[%c0_40, %c0_41, %c48], %96 {strides = array<i32>} : memref<1x8x64xf32, #tpu.memory_space<vmem>>, vector<1x8x8xf32>,
    %97 = vector.extract_strided_slice %12 {offsets = [112, 0], sizes = [8, 8], strides = [1, 1]} : vector<128x8xf32> to vector<8x8xf32>
    %98 = vector.extract_strided_slice %12 {offsets = [120, 0], sizes = [8, 8], strides = [1, 1]} : vector<128x8xf32> to vector<8x8xf32>
    %cst_42 = arith.constant 5.000000e-01 : f32
    %99 = vector.broadcast %cst_42 : f32 to vector<8x8xf32>
    %100 = arith.mulf %97, %99 : vector<8x8xf32>
    %cst_43 = arith.constant 5.000000e-01 : f32
    %101 = vector.broadcast %cst_43 : f32 to vector<8x8xf32>
    %102 = arith.mulf %98, %101 : vector<8x8xf32>
    %103 = arith.addf %100, %102 : vector<8x8xf32>
    %104 = vector.extract_strided_slice %8 {offsets = [0, 56], sizes = [8, 8], strides = [1, 1]} : vector<8x64xf32> to vector<8x8xf32>
    %105 = arith.addf %104, %103 : vector<8x8xf32>
    %c0_44 = arith.constant 0 : index
    %c0_45 = arith.constant 0 : index
    %c56 = arith.constant 56 : index
    %106 = vector.load %arg6[%c0_44, %c0_45, %c56] : memref<1x8x64xf32, #tpu.memory_space<vmem>>, vector<1x8x8xf32>
    %107 = vector.shape_cast %106 : vector<1x8x8xf32> to vector<8x8xf32>
    %108 = vector.shape_cast %105 : vector<8x8xf32> to vector<1x8x8xf32>
    tpu.vector_store %arg6[%c0_44, %c0_45, %c56], %108 {strides = array<i32>} : memref<1x8x64xf32, #tpu.memory_space<vmem>>, vector<1x8x8xf32>,
    return
  }
  func.func @transform_0(%arg0: i32) -> (i32, i32, i32) {
    %c0_i32 = arith.constant 0 : i32
    %c0_i32_0 = arith.constant 0 : i32
    %c0_i32_1 = arith.constant 0 : i32
    return %arg0, %c0_i32, %c0_i32_0 : i32, i32, i32
  }
  func.func @transform_1(%arg0: i32) -> (i32, i32) {
    %c0_i32 = arith.constant 0 : i32
    %c0_i32_0 = arith.constant 0 : i32
    %c0_i32_1 = arith.constant 0 : i32
    return %c0_i32, %c0_i32_0 : i32, i32
  }
  func.func @transform_2(%arg0: i32) -> (i32, i32) {
    %c0_i32 = arith.constant 0 : i32
    %c0_i32_0 = arith.constant 0 : i32
    %c0_i32_1 = arith.constant 0 : i32
    return %c0_i32, %c0_i32_0 : i32, i32
  }
  func.func @transform_3(%arg0: i32) -> (i32, i32, i32) {
    %c0_i32 = arith.constant 0 : i32
    %c0_i32_0 = arith.constant 0 : i32
    %c0_i32_1 = arith.constant 0 : i32
    return %arg0, %c0_i32, %c0_i32_0 : i32, i32, i32
  }
  func.func @transform_4(%arg0: i32) -> (i32, i32) {
    %c0_i32 = arith.constant 0 : i32
    %c0_i32_0 = arith.constant 0 : i32
    %c0_i32_1 = arith.constant 0 : i32
    return %c0_i32, %c0_i32_0 : i32, i32
  }
  func.func @transform_5(%arg0: i32) -> (i32, i32, i32) {
    %c0_i32 = arith.constant 0 : i32
    %c0_i32_0 = arith.constant 0 : i32
    %c0_i32_1 = arith.constant 0 : i32
    return %arg0, %c0_i32, %c0_i32_0 : i32, i32, i32
  }
}

</mosaic_0001>

<bundles_post_ra>
// kernel: tpu_custom_call.1
= control target key start
LH: loop header
LB: loop body
LE: loop exit
PB: predicated region body
PF: predicated region fallthrough
CT: control target
= control target key end

     0   :  { %10 = vsyncpa [#allocation3], 0  ;;  %s1081_s0 = inlined_call_operand.vmem [shape: bf16[2,72,64], index: 0, kind: input, shape index: {}]   ;;  %s1082_s1 = inlined_call_operand.vmem [shape: bf16[8,72], index: 1, kind: input, shape index: {}]   ;;  %s1083_s2 = inlined_call_operand.vmem [shape: f32[8,1], index: 2, kind: input, shape index: {}]   ;;  %s1084_s3 = inlined_call_operand.vmem [shape: bf16[2,128,16], index: 3, kind: input, shape index: {}]   ;;  %s1085_s4 = inlined_call_operand.vmem [shape: bf16[16,8], index: 4, kind: input, shape index: {}]   ;;  %s1086_s5 = inlined_call_operand.hbm [shape: f32[2,8,64], index: 5, kind: output, shape index: {}]  }
   0x1   :  { %12 = vsyncpa [#allocation3 + $0x1], 0  ;;  %s936_s18 = smov 0   ;;  %s938_s19 = smov 0  }
   0x2   :  { %s940_s20 = smov 0   ;;  %s942_s21 = smov 0  }
   0x3 LB: > { %s957_s22 = sadd.s32 4294967295, %s893_s21   ;;  %s683_s23 = sadd.s32 4294967294, %s893_s21   ;;  %s893_s21 = sphi %s942_s21, %s1092_s21   ;;  %s889_s20 = sphi %s940_s20, %s1091_s20   ;;  %s885_s19 = sphi %s938_s19, %s1090_s19   ;;  %s881_s18 = sphi %s936_s18, %s1089_s18  }
   0x4   : > { %s961_s24 = sadd.s32 1, %s893_s21   ;;  %s140_s25 = sadd.s32 1, %s889_s20 }
   0x5   : > { %s137_s26 = ssub.s32 %s893_s21, %s961_s24  ;;  %p150_p0 = scmp.ne.s32.totalorder %s889_s20, %s885_s19 }
   0x6   : > { %p138_p1 = scmp.eq.s32.totalorder %s137_s26, 0  ;;  %p151_p2 = scmp.eq.s32.totalorder %s957_s22, 1 }
   0x7   : > { %p156_p3 = scmp.ne.s32.totalorder %s885_s19, %s881_s18  ;;  %p157_p4 = scmp.eq.s32.totalorder %s683_s23, 1 }
   0x8   : > { %s972_s27 = scalar_select %p138_p1, %s889_s20, %s140_s25  }
   0x9   : > { %p974_p5 = por %p151_p2, %p150_p0  ;;  %p978_p6 = por %p157_p4, %p156_p3 }
   0xa   : > { %p686_p7 = scmp.ge.s32.totalorder %s893_s21, 1  ;;  %p200_p8 = scmp.lt.s32.totalorder %s893_s21, 3 }
   0xc   : > { %p201_p9 = pnand %p686_p7, %p200_p8 }
   0xd   : > { %v817_v0 = vld [vmem:[%s1085_s4] sm:$0xff] (!%p201_p9)   ;;  %v895_v1 = vmov (!%p201_p9), 0.0   ;;  %p233_p10 = scmp.lt.s32.totalorder (!%p201_p9), %s957_s22, 1  ;;  %vm896_vm0 = vmmov (!%p201_p9), 0   ;;  %v897_v3 = vmov (!%p201_p9), 0   ;;  %vm400_vm1 = vcmask (!%p201_p9), 130048  }
   0xe   : > { %204 = sbr.rel (%p201_p9) target bundleno = 402 (0x192), region = 40  ;;  %734 = vmatprep.subr.bf16.mxu0 (!%p201_p9), %v895_v1  ;;  %748 = vmatprep.subr.bf16.mxu1 (!%p201_p9), %v817_v0  ;;  %v254_v2 = vld [vmem:[%s1083_s2] sm:$0xff] (!%p201_p9)  ;;  %vm291_vm2 = vcmask (!%p201_p9), 1043456   ;;  %vm287_vm3 = vcmask (!%p201_p9), 588800   ;;  %s898_s26 = smov (!%p201_p9), 8   ;;  %vm526_vm4 = vcmask (!%p201_p9), 64512  }
   0xf   : > { %744 = vmatprep.mubr.msk.bf16.mxu0 (!%p201_p9), %vm896_vm0, %v895_v1  ;;  %749 = vmatpush3.bf16.msra.mxu1 (!%p201_p9), %v817_v0  ;;  %v244_v17 = vld [vmem:[%s1082_s1] sm:$0xf] (!%p201_p9)  ;;  %s899_s30 = smov (!%p201_p9), 24   ;;  %s230_s6 = sand.u32 (!%p201_p9), 1, %s885_s19   ;;  %vm536_vm5 = vcmask (!%p201_p9), 130112   ;;  %vm546_vm6 = vcmask (!%p201_p9), 195712  }
  0x10   : > { %816 = vset.pattern.permute.xlu0 (!%p201_p9), %v897_v3  ;;  %s900_s7 = smov (!%p201_p9), 16   ;;  %s687_s8 = sshll.u32 (!%p201_p9), %s230_s6, 3  ;;  %vm556_vm7 = vcmask (!%p201_p9), 261312   ;;  %vm566_vm8 = vcmask (!%p201_p9), 326912   ;;  %vm576_vm9 = vcmask (!%p201_p9), 392512   ;;  %vm586_vm10 = vcmask (!%p201_p9), 458112  }
  0x11   : > { %257 = vperm.xlu0 (!%p201_p9), %816, %v254_v2   ;;  %s903_s12 = smov (!%p201_p9), 56   ;;  %s904_s13 = smov (!%p201_p9), 48   ;;  %vm596_vm11 = vcmask (!%p201_p9), 523712  }
  0x15   : > { %s234_s9 = scalar_select %p233_p10, %s957_s22, 1 }
  0x17   : > { %s718_s10 = sshll.u32 %s234_s9, 6  ;;  %s766_s11 = smul.u32 36, %s234_s9 }
  0x18   : > { %s995_s14 = scalar_lea.vmem %s1084_s3, %s718_s10  ;;  %s901_s9 = smov 40  }
  0x19   : > { %v818_v4 = vld [vmem:[%s995_s14] sm:$0xff]   ;;  %s237_s17 = scalar_lea.vmem %s1081_s0, %s766_s11  ;;  %v820_v6 = vld [vmem:[%s995_s14 + $0x8] sm:$0xff]   ;;  %v822_v8 = vld [vmem:[%s995_s14 + $0x10] sm:$0xff]   ;;  %s902_s10 = smov 32  }
  0x1a   : > { %v819_v5 = vld [vmem:[%s237_s17] sm:$0xff]   ;;  %750 = vmatprep.mubr.msk.bf16.mxu1 %vm400_vm1, %v818_v4  ;;  %v821_v7 = vld [vmem:[%s237_s17 + $0x8] sm:$0xff]   ;;  %v823_v9 = vld [vmem:[%s237_s17 + $0x10] sm:$0xff]   ;;  %s1022_s11 = scalar_lea.vmem [#allocation2], %s687_s8 }
  0x1b   : > { %735 = vmatpush3.bf16.msra.mxu0 %v819_v5  ;;  %751 = vmatmul.mubr.msk.bf16.vlgmr.msra.gmra.mrb[0].mxu1 %vm400_vm1, %v820_v6  ;;  %v824_v10 = vld [vmem:[%s995_s14 + $0x18] sm:$0xff]   ;;  %v826_v11 = vld [vmem:[%s995_s14 + $0x20] sm:$0xff]   ;;  %v828_v15 = vld [vmem:[%s995_s14 + $0x28] sm:$0xff]   ;;  %s612_s15 = sshll.u32 %s1022_s11, 4  ;;  %s1037_s15 = int_to_ptr.vmem [resolvable:$true] %s612_s15 }
  0x1c   : > { %736 = vmatprep.subr.bf16.mxu0 %v895_v1  ;;  %754 = vmatprep.mubr.msk.bf16.mxu1 %vm400_vm1, %v822_v8  ;;  %v825_v12 = vld [vmem:[%s237_s17 + $0x18] sm:$0xff]   ;;  %v827_v13 = vld [vmem:[%s237_s17 + $0x20] ss:$0 sps:$4 sm:$0xff]   ;;  %v829_v16 = vld [vmem:[%s995_s14 + $0x30] sm:$0xff]   ;;  %s831_s25 = scalar_lea.vmem %s1037_s15, 128 }
  0x1d   : > { %v293_v14 = vsel %vm291_vm2, %v827_v13, 0  ;;  %v830_v18 = vld [vmem:[%s995_s14 + $0x38] sm:$0xff]   ;;  %s715_s14 = sshll.u32 %s957_s22, 7  ;;  %s599_s22 = scalar_lea.sflag [#allocation3], %s230_s6 }
  0x1e   : > { %s1035_s23 = scalar_lea.hbm %s1086_s5, %s715_s14  ;;  %p832_p11 = scmp.ne.s32.totalorder %s1037_s15, %s831_s25 }
  0x1f   : > { %737 = vmatpush3.bf16.msra.mxu0 %v821_v7 }
  0x20   : > { %738 = vmatprep.subr.bf16.mxu0 %v895_v1  ;;  %p833_p12 = pnand %p832_p11, %p974_p5 }
  0x22   : > { %p834_p13 = pneg %p833_p12 }
  0x23   : > { %739 = vmatpush3.bf16.msra.mxu0 %v823_v9  ;;  %755 = vmatmul.mubr.msk.bf16.gmra.mrb[4].mxu1 %vm400_vm1, %v824_v10 }
  0x24   : > { %740 = vmatprep.subr.bf16.mxu0 %v895_v1  ;;  %758 = vmatprep.mubr.msk.bf16.mxu1 %vm400_vm1, %v826_v11 }
  0x27   : > { %741 = vmatpush3.bf16.msra.mxu0 %v825_v12 }
  0x28   : > { %742 = vmatprep.subr.bf16.mxu0 %v895_v1 }
  0x2b   : > { %743 = vmatpush3.bf16.msra.mxu0 %v293_v14  ;;  %759 = vmatmul.mubr.msk.bf16.gmra.mrb[8].mxu1 %vm400_vm1, %v828_v15 }
  0x2c   : > { %762 = vmatprep.mubr.msk.bf16.mxu1 %vm400_vm1, %v829_v16 }
  0x2e   : > { %745 = vmatmul.mubr.msk.bf16.vlgmr.msra.gmra.mrb[0].mxu0 %vm287_vm3, %v244_v17 }
  0x33   : > { %763 = vmatmul.mubr.msk.bf16.gmra.mrb[12].mxu1 %vm400_vm1, %v830_v18 }
  0x90   : > { %v258_v40 = vpop.permute.xlu0 %257 }
  0xee   : > { %v752_v19 = vpop.f32.mrb[0].mxu1 }
  0xef   : > { %v459_v20 = vpop.f32.mrb[1].mxu1  ;;  %v528_v22 = vmul.f32 0.5, %v752_v19 }
  0xf0   : > { %v753_v21 = vpop.f32.mrb[2].mxu1  ;;  %v522_v25 = vmul.f32 0.5, %v459_v20 }
  0xf1   : > { %v529_v23 = vmul.f32 0.5, %v753_v21  ;;  %v462_v24 = vpop.f32.mrb[3].mxu1 }
  0xf2   : > { %v523_v26 = vmul.f32 0.5, %v462_v24 }
  0xf3   : > { %v530_v27 = vadd.f32 %v529_v23, %v528_v22 }
  0xf4   : > { %v524_v28 = vadd.f32 %v523_v26, %v522_v25 }
  0xf5   : > { %532 = vrot.lane.b32.xlu0 %v530_v27, %s898_s26  ;;  %s905_s26 = smov [#allocation2]  }
  0xf6   : > { %v756_v29 = vpop.f32.mrb[4].mxu1 }
  0xf7   : > { %v475_v30 = vpop.f32.mrb[5].mxu1  ;;  %v548_v32 = vmul.f32 0.5, %v756_v29 }
  0xf8   : > { %v757_v31 = vpop.f32.mrb[6].mxu1  ;;  %v538_v35 = vmul.f32 0.5, %v475_v30 }
  0xf9   : > { %v549_v33 = vmul.f32 0.5, %v757_v31  ;;  %v478_v34 = vpop.f32.mrb[7].mxu1 }
  0xfa   : > { %v539_v36 = vmul.f32 0.5, %v478_v34 }
  0xfb   : > { %v550_v37 = vadd.f32 %v549_v33, %v548_v32 }
  0xfc   : > { %v540_v38 = vadd.f32 %v539_v36, %v538_v35 }
  0xfd   : > { %552 = vrot.lane.b32.xlu1 %v550_v37, %s899_s30  ;;  %s835_s30 = sshll.u32 %s905_s26, 4  ;;  %s836_s30 = int_to_ptr.vmem [resolvable:$false] %s835_s30 }
  0xfe   : > { %v760_v39 = vpop.f32.mrb[8].mxu1  ;;  %p838_p0 = scmp.lt.s32.totalorder %s1037_s15, %s836_s30 }
  0xff   : > { %v491_v41 = vpop.f32.mrb[9].mxu1  ;;  %v568_v44 = vmul.f32 0.5, %v760_v39 }
 0x100   : > { %v761_v42 = vpop.f32.mrb[10].mxu1  ;;  %v558_v49 = vmul.f32 0.5, %v491_v41 }
 0x101   : > { %v329_v43 = vpop.f32.mrb[0].mxu0  ;;  %v569_v45 = vmul.f32 0.5, %v761_v42  ;;  %542 = vrot.lane.b32.xlu1 %v540_v38, %s900_s7  ;;  %v494_v47 = vpop.f32.mrb[11].mxu1  ;;  %s837_s7 = scalar_lea.vmem %s836_s30, 256 }
 0x102   : > { %v330_v46 = vadd.f32 %v329_v43, %v258_v40  ;;  %v746_v48 = vpop.f32.mrb[1].mxu0  ;;  %v559_v50 = vmul.f32 0.5, %v494_v47  ;;  %p839_p1 = scmp.lt.s32.totalorder %s837_s7, %s831_s25 }
 0x103   : > { %v332_v51 = vpop.f32.mrb[2].mxu0  ;;  %v570_v52 = vadd.f32 %v569_v45, %v568_v44 }
 0x104   : > { %v335_v53 = vmax.f32 %v330_v46, 0.0  ;;  %v747_v54 = vpop.f32.mrb[3].mxu0  ;;  %v560_v55 = vadd.f32 %v559_v50, %v558_v49  ;;  %p840_p2 = por %p839_p1, %p838_p0 }
 0x105   : > { %572 = vrot.lane.b32.xlu1 %v570_v52, %s901_s9 }
 0x106   : > { %v525_v56 = vadd.f32 %v524_v28, %v335_v53  ;;  %562 = vrot.lane.b32.xlu0 %v560_v55, %s902_s10  ;;  %v764_v57 = vpop.f32.mrb[12].mxu1  ;;  %p841_p3 = pnand %p840_p2, %p834_p13 }
 0x107   : > { %v507_v58 = vpop.f32.mrb[13].mxu1  ;;  %v588_v60 = vmul.f32 0.5, %v764_v57 }
 0x108   : > { %527 = vst.msk [vmem:[%s1022_s11] sm:$0xff] %vm526_vm4, %v525_v56  ;;  %v765_v59 = vpop.f32.mrb[14].mxu1  ;;  %v578_v63 = vmul.f32 0.5, %v507_v58 }
 0x109   : > { %v589_v61 = vmul.f32 0.5, %v765_v59  ;;  %v510_v62 = vpop.f32.mrb[15].mxu1 }
 0x10a   : > { %v579_v0 = vmul.f32 0.5, %v510_v62 }
 0x10b   : > { %v590_v1 = vadd.f32 %v589_v61, %v588_v60 }
 0x10c   : > { %v580_v2 = vadd.f32 %v579_v0, %v578_v63 }
 0x10d   : > { %592 = vrot.lane.b32.xlu1 %v590_v1, %s903_s12 }
 0x10e   : > { %582 = vrot.lane.b32.xlu0 %v580_v2, %s904_s13 }
 0x167   : > { %v533_v3 = vpop.permute.xlu0 %532 }
 0x168   : > { %v535_v4 = vadd.f32 %v533_v3, %v335_v53 }
 0x16a   : > { %537 = vst.msk [vmem:[%s1022_s11] sm:$0xff] %vm536_vm5, %v535_v4 }
 0x16f   : > { %v553_v5 = vpop.permute.xlu1 %552 }
 0x170   : > { %v555_v8 = vadd.f32 %v553_v5, %v335_v53 }
 0x173   : > { %v543_v6 = vpop.permute.xlu1 %542 }
 0x174   : > { %v545_v7 = vadd.f32 %v543_v6, %v335_v53 }
 0x176   : > { %547 = vst.msk [vmem:[%s1022_s11] sm:$0xff] %vm546_vm6, %v545_v7 }
 0x177   : > { %v573_v9 = vpop.permute.xlu1 %572  ;;  %557 = vst.msk [vmem:[%s1022_s11] sm:$0xff] %vm556_vm7, %v555_v8 }
 0x178   : > { %v563_v10 = vpop.permute.xlu0 %562  ;;  %v575_v12 = vadd.f32 %v573_v9, %v335_v53 }
 0x179   : > { %v565_v11 = vadd.f32 %v563_v10, %v335_v53 }
 0x17b   : > { %567 = vst.msk [vmem:[%s1022_s11] sm:$0xff] %vm566_vm8, %v565_v11 }
 0x17c   : > { %577 = vst.msk [vmem:[%s1022_s11] sm:$0xff] %vm576_vm9, %v575_v12 }
 0x17f   : > { %v593_v13 = vpop.permute.xlu1 %592 }
 0x180   : > { %v583_v14 = vpop.permute.xlu0 %582  ;;  %v595_v16 = vadd.f32 %v593_v13, %v335_v53 }
 0x181   : > { %v585_v15 = vadd.f32 %v583_v14, %v335_v53 }
 0x183   : > { %587 = vst.msk [vmem:[%s1022_s11] sm:$0xff] %vm586_vm10, %v585_v15 }
 0x184   : > { %597 = vst.msk [vmem:[%s1022_s11] sm:$0xff] %vm596_vm11, %v595_v16 }
 0x185   : > { %844 = shalt.err (!%p841_p3)
}
 0x186   : > { %s845_s6 = scalar_lea.hbm %s1035_s23, 128  ;;  %s849_s10 = scalar_lea.hbm %s1086_s5, 256 }
 0x187   : > { %p846_p4 = scmp.ne.s32.totalorder %s1035_s23, %s845_s6  ;;  %p850_p9 = scmp.lt.u32.totalorder %s1035_s23, %s1086_s5 }
 0x188   : > { %p851_p10 = scmp.lt.u32.totalorder %s849_s10, %s845_s6  ;;  %p853_p12 = scmp.lt.u32.totalorder %s845_s6, %s1035_s23 }
 0x189   : > { %p847_p7 = pnand %p846_p4, %p974_p5 }
 0x18a   : > { %p852_p11 = por %p851_p10, %p850_p9 }
 0x18b   : > { %p848_p8 = pneg %p847_p7 }
 0x18c   : > { %p854_p13 = por %p853_p12, %p852_p11 }
 0x18e   : > { %p855_p0 = pnand %p854_p13, %p848_p8 }
 0x190   : > { %858 = shalt.err (!%p855_p0)
}
 0x191   : > { %767 = dma.vmem_to_hbm [thread:$0]  (%p974_p5), %s1037_s15, 128, %s1035_s23, %s599_s22  }
 0x192 PF: > { %p773_p1 = scmp.ge.s32.totalorder %s893_s21, 2  ;;  %s624_s13 = sand.u32 1, %s881_s18  }
 0x193   : > { %s625_s14 = scalar_lea.sflag [#allocation3], %s624_s13 }
 0x194   : > { %p770_p2 = pnand %p773_p1, %p978_p6 }
 0x196   : > { %876 = dma.done.wait (!%p770_p2), %s625_s14, 128  }
 0x197   : > { %878 = vsyncadd (!%p770_p2), %s625_s14, 4294967168  ;;  %p15_p3 = scmp.ge.s32.totalorder %s961_s24, 4   ;;  %s1089_s18 = smov %s885_s19 }
 0x198   : > { %s1090_s19 = smov %s889_s20  ;;  %s1091_s20 = smov %s972_s27 }
 0x199   : > { %s1092_s21 = smov %s961_s24  ;;  %17 = sbr.rel (!%p15_p3) target bundleno = 3 (0x3), region = 78 }
 0x1a0   :  { %630 = vsyncpa [#allocation3], 1 }
 0x1a1   :  { %632 = vsyncpa [#allocation3 + $0x1], 1 }

</bundles_post_ra>
